<compile_context>
chip_gen: v7x
topology: tpu7x:2x2x1
jax: 0.10.0
libtpu: 0.0.40
codegen_flags: <defaults>
</compile_context>

<pallas_src>
import numpy as np
import jax
import jax.numpy as jnp
from jax.experimental import pallas as pl
from jax.experimental.pallas import tpu as pltpu


def _round_up(n, m):
    return ((n + m - 1) // m) * m


def _cfcn_kernel(x_ref, wcat_ref, wf0_ref, wf1_ref, bin_ref, out_ref):
    """One batch tile of the CFCN forward.

    x_ref    : (bt, D_pad)              bf16, column D holds a constant 1.0 (bias)
    wcat_ref : (D_pad, 2*H_pad + D_pad) bf16, [W0*m|b0 ; W1*m|b1 ; W2*m|b2] packed
    wf0_ref  : (H_pad, H_pad)           bf16, feature_layers[0] weight*mask
    wf1_ref  : (H_pad, D_pad)           bf16, feature_layers[1] weight*mask
    bin_ref  : (1, D_pad)               f32, 1.0 on 'bin' columns, 0 elsewhere
    out_ref  : (bt, D_pad)              f32
    """
    h = wf0_ref.shape[0]
    d = out_ref.shape[1]

    def swish(v):
        # EUP sigmoid + one VPU multiply, all f32.
        return v * jax.nn.sigmoid(v)

    # One wide MXU pass shared by the three input layers (bias folded in via the
    # constant-1 column of x).  Slices are 128-aligned -> no layout copies.
    z = jnp.dot(x_ref[...], wcat_ref[...], preferred_element_type=jnp.float32)
    z0 = z[:, :h]
    z1 = z[:, h:2 * h]
    z2 = z[:, 2 * h:2 * h + d]

    # layer 0: Y = input_layers[0](X); Swish; dropout (identity at inference)
    y = swish(z0)
    # layer 1: Y = input_layers[1](X) + feature_layers[0](Y); Swish; dropout
    y = swish(z1 + jnp.dot(y.astype(jnp.bfloat16), wf0_ref[...],
                           preferred_element_type=jnp.float32))
    # layer 2 (last): Y = input_layers[2](X) + feature_layers[1](Y); no activation
    y = z2 + jnp.dot(y.astype(jnp.bfloat16), wf1_ref[...],
                     preferred_element_type=jnp.float32)

    # output head: sigmoid on 'bin' variable columns, identity on 'cont' columns
    bm = bin_ref[...]
    out_ref[...] = jnp.where(bm > 0.5, jax.nn.sigmoid(y), y)


def pack_params(params, bin_mask, *, matmul_dtype=jnp.bfloat16):
    """Host-side packing: fold masks into weights, concatenate the three
    input-layer weights (+ biases via an extra 'ones' input row), zero-pad all
    feature dims to multiples of 128 and cast matmul operands to bf16."""
    (w0, m0, b0), (w1, m1, b1), (w2, m2, b2) = params["input_layers"]
    (wf0, mf0), (wf1, mf1) = params["feature_layers"]

    D = int(w0.shape[0])
    H = int(w0.shape[1])
    D_pad = _round_up(D + 1, 128)      # +1 row/column for the folded bias
    H_pad = _round_up(H, 128)
    n_cat = 2 * H_pad + D_pad

    def fold(w, m):
        return np.asarray(w, np.float32) * np.asarray(m, np.float32)

    wcat = np.zeros((D_pad, n_cat), np.float32)
    wcat[:D, 0:H] = fold(w0, m0)
    wcat[D, 0:H] = np.asarray(b0, np.float32).reshape(-1)
    wcat[:D, H_pad:H_pad + H] = fold(w1, m1)
    wcat[D, H_pad:H_pad + H] = np.asarray(b1, np.float32).reshape(-1)
    wcat[:D, 2 * H_pad:2 * H_pad + D] = fold(w2, m2)
    wcat[D, 2 * H_pad:2 * H_pad + D] = np.asarray(b2, np.float32).reshape(-1)

    wf0_p = np.zeros((H_pad, H_pad), np.float32)
    wf0_p[:H, :H] = fold(wf0, mf0)
    wf1_p = np.zeros((H_pad, D_pad), np.float32)
    wf1_p[:H, :D] = fold(wf1, mf1)

    bin_p = np.zeros((1, D_pad), np.float32)
    bin_p[:, :D] = np.asarray(bin_mask, np.float32)

    return {
        "D": D, "H": H, "D_pad": D_pad, "H_pad": H_pad,
        "wcat": jnp.asarray(wcat, matmul_dtype),
        "wf0": jnp.asarray(wf0_p, matmul_dtype),
        "wf1": jnp.asarray(wf1_p, matmul_dtype),
        "bin": jnp.asarray(bin_p, jnp.float32),
    }


def cfcn_forward(x, packed, *, batch_tile=128):
    B, D = x.shape
    assert D == packed["D"]
    D_pad, H_pad = packed["D_pad"], packed["H_pad"]
    n_cat = 2 * H_pad + D_pad
    B_pad = _round_up(B, batch_tile)

    # Pad batch & features; append the constant 1.0 column that carries the bias.
    x_pad = jnp.zeros((B_pad, D_pad), jnp.float32)
    x_pad = x_pad.at[:B, :D].set(x).at[:, D].set(1.0)
    x_pad = x_pad.astype(packed["wcat"].dtype)

    grid = (B_pad // batch_tile,)

    def resident(shape):
        # Constant index_map: fetched once, stays resident across the batch grid.
        return pl.BlockSpec(shape, lambda b: (0, 0))

    in_specs = [
        pl.BlockSpec((batch_tile, D_pad), lambda b: (b, 0)),   # x tile
        resident((D_pad, n_cat)),                              # packed input-layer W (+bias)
        resident((H_pad, H_pad)),                              # feature layer 0
        resident((H_pad, D_pad)),                              # feature layer 1
        resident((1, D_pad)),                                  # bin-column mask
    ]
    out_specs = pl.BlockSpec((batch_tile, D_pad), lambda b: (b, 0))

    # Explicit VMEM budget: double-buffered x/out tiles + resident weight blocks.
    def nbytes(shape, dtype):
        return int(np.prod(shape)) * jnp.dtype(dtype).itemsize
    est = 2 * (nbytes((batch_tile, D_pad), packed["wcat"].dtype)
               + nbytes((batch_tile, D_pad), jnp.float32)
               + nbytes((D_pad, n_cat), packed["wcat"].dtype)
               + nbytes((H_pad, H_pad), packed["wf0"].dtype)
               + nbytes((H_pad, D_pad), packed["wf1"].dtype)
               + nbytes((8, D_pad), jnp.float32))
    vmem_limit = int(min(max(4 * est, 16 * 1024 * 1024), 32 * 1024 * 1024))

    out_pad = pl.pallas_call(
        _cfcn_kernel,
        out_shape=jax.ShapeDtypeStruct((B_pad, D_pad), jnp.float32),
        grid=grid,
        in_specs=in_specs,
        out_specs=out_specs,
        compiler_params=pltpu.CompilerParams(
            dimension_semantics=("parallel",),
            vmem_limit_bytes=vmem_limit),
    )(x_pad, packed["wcat"], packed["wf0"], packed["wf1"], packed["bin"])

    return out_pad[:B, :D]


def tile_mask(mask, target_rows, target_cols):
    """Replicates MaskedLinear.set_mask's np.repeat tiling."""
    r, c = mask.shape
    return np.repeat(np.repeat(mask, target_rows // r, axis=0),
                     target_cols // c, axis=1).astype(np.float32)


def init_params(key, neurons_per_layer, adj):
    """Deterministic synthetic parameters matching the module's shapes."""
    D = adj.shape[0]
    diag_adj = adj + np.eye(D, dtype=np.float32)
    keys = jax.random.split(key, 2 * len(neurons_per_layer))
    ki = 0

    input_layers = []
    for i in range(1, len(neurons_per_layer)):
        in_f, out_f = neurons_per_layer[0], neurons_per_layer[i]
        bound = 1.0 / np.sqrt(in_f)
        w = jax.random.uniform(keys[ki], (in_f, out_f), jnp.float32, -bound, bound)
        ki += 1
        m = jnp.asarray(tile_mask(adj, in_f, out_f))
        b = jnp.full((1, out_f), 0.01, jnp.float32)     # use_bias=True -> bias = 0.01
        input_layers.append((w, m, b))

    feature_layers = []
    for i in range(2, len(neurons_per_layer)):
        in_f, out_f = neurons_per_layer[i - 1], neurons_per_layer[i]
        bound = 1.0 / np.sqrt(in_f)
        w = jax.random.uniform(keys[ki], (in_f, out_f), jnp.float32, -bound, bound)
        ki += 1
        m = jnp.asarray(tile_mask(diag_adj, in_f, out_f))
        feature_layers.append((w, m))                   # use_bias=False -> bias = 0

    return {"input_layers": input_layers, "feature_layers": feature_layers}


def cfcn_reference(x, params, bin_mask, matmul_dtype=jnp.float32):
    """Pure-JAX reference of the same forward.  matmul_dtype lets the reference
    mirror the kernel's bf16 MXU operands (with f32 accumulation) for a tight
    correctness check."""
    (w0, m0, b0), (w1, m1, b1), (w2, m2, b2) = params["input_layers"]
    (wf0, mf0), (wf1, mf1) = params["feature_layers"]

    def mm(a, w, m):
        wm = (w * m).astype(matmul_dtype)
        return jnp.dot(a.astype(matmul_dtype), wm,
                       preferred_element_type=jnp.float32)

    swish = lambda v: v * jax.nn.sigmoid(v)
    y = swish(mm(x, w0, m0) + b0)
    y = swish(mm(x, w1, m1) + b1 + mm(y, wf0, mf0))
    y = mm(x, w2, m2) + b2 + mm(y, wf1, mf1)
    return jnp.where(bin_mask > 0.5, jax.nn.sigmoid(y), y)


if __name__ == "__main__":
    D = 8                                  # number of DAG variables (= in/out width)
    H = 16                                 # hidden width (multiple of D, as mask tiling requires)
    B = 512                                # batch: 4 grid steps of 128 rows
    neurons_per_layer = [D, H, H, D]

    # DAG adjacency: edge i -> j iff i < j (variables in topological order)
    adj = np.triu(np.ones((D, D), dtype=np.float32), k=1)
    # var_types alternate 'cont' / 'bin'; 'bin' columns get a sigmoid output head
    var_types = ["cont" if i % 2 == 0 else "bin" for i in range(D)]
    bin_mask = jnp.asarray([[1.0 if t == "bin" else 0.0 for t in var_types]],
                           dtype=jnp.float32)

    key = jax.random.PRNGKey(0)
    kx, kp = jax.random.split(key)
    x = jax.random.normal(kx, (B, D), jnp.float32)
    params = init_params(kp, neurons_per_layer, adj)
    packed = pack_params(params, bin_mask)

    y = cfcn_forward(x, packed, batch_tile=128)
    y = jax.block_until_ready(y)

    # Tight check: reference using the same bf16 MXU operand precision as the kernel.
    y_ref_bf16 = cfcn_reference(x, params, bin_mask, matmul_dtype=jnp.bfloat16)
    np.testing.assert_allclose(np.asarray(y), np.asarray(y_ref_bf16),
                               rtol=1e-3, atol=1e-3)
    # Coarse sanity check against the full-f32 forward (difference is bf16 rounding only).
    y_ref_f32 = cfcn_reference(x, params, bin_mask, matmul_dtype=jnp.float32)
    np.testing.assert_allclose(np.asarray(y), np.asarray(y_ref_f32),
                               rtol=1e-1, atol=1e-1)
    print("KERNEL_OK")
</pallas_src>

<mosaic_0001>
module attributes {stable_mosaic.version = 11 : i64} {
  func.func @_cfcn_kernel(%arg0: i32, %arg1: memref<128x128xbf16, #tpu.memory_space<vmem>>, %arg2: memref<128x384xbf16, #tpu.memory_space<vmem>>, %arg3: memref<128x128xbf16, #tpu.memory_space<vmem>>, %arg4: memref<128x128xbf16, #tpu.memory_space<vmem>>, %arg5: memref<1x128xf32, #tpu.memory_space<vmem>>, %arg6: memref<128x128xf32, #tpu.memory_space<vmem>>) attributes {dimension_semantics = [#tpu.dimension_semantics<parallel>], iteration_bounds = array<i64: 4>, scalar_prefetch = 0 : i64, scratch_operands = 0 : i64, tpu.core_type = #tpu.core_type<tc>, window_params = [{transform_indices = @transform_0, window_bounds = array<i64: 128, 128>}, {pipeline_mode = #tpu.pipeline_mode<synchronous>, transform_indices = @transform_1, window_bounds = array<i64: 128, 384>}, {pipeline_mode = #tpu.pipeline_mode<synchronous>, transform_indices = @transform_2, window_bounds = array<i64: 128, 128>}, {pipeline_mode = #tpu.pipeline_mode<synchronous>, transform_indices = @transform_3, window_bounds = array<i64: 128, 128>}, {pipeline_mode = #tpu.pipeline_mode<synchronous>, transform_indices = @transform_4, window_bounds = array<i64: 1, 128>}, {transform_indices = @transform_5, window_bounds = array<i64: 128, 128>}]} {
    %c0 = arith.constant 0 : index
    %c0_0 = arith.constant 0 : index
    %0 = vector.load %arg1[%c0, %c0_0] : memref<128x128xbf16, #tpu.memory_space<vmem>>, vector<128x128xbf16>
    %c0_1 = arith.constant 0 : index
    %c0_2 = arith.constant 0 : index
    %1 = vector.load %arg2[%c0_1, %c0_2] : memref<128x384xbf16, #tpu.memory_space<vmem>>, vector<128x384xbf16>
    %cst = arith.constant dense<0.000000e+00> : vector<128x384xf32>
    %2 = tpu.matmul %0, %1, %cst {dimension_numbers = #tpu.dot_dimension_numbers<[1], [0], [0], [1], [0, 0, 1, 1], [], []>} : vector<128x128xbf16>, vector<128x384xbf16>, vector<128x384xf32> -> vector<128x384xf32>
    %3 = vector.extract_strided_slice %2 {offsets = [0, 0], sizes = [128, 128], strides = [1, 1]} : vector<128x384xf32> to vector<128x128xf32>
    %4 = vector.extract_strided_slice %2 {offsets = [0, 128], sizes = [128, 128], strides = [1, 1]} : vector<128x384xf32> to vector<128x128xf32>
    %5 = vector.extract_strided_slice %2 {offsets = [0, 256], sizes = [128, 128], strides = [1, 1]} : vector<128x384xf32> to vector<128x128xf32>
    %6 = arith.negf %3 : vector<128x128xf32>
    %7 = math.exp %6 : vector<128x128xf32>
    %cst_3 = arith.constant 1.000000e+00 : f32
    %8 = vector.broadcast %cst_3 : f32 to vector<128x128xf32>
    %9 = arith.addf %8, %7 : vector<128x128xf32>
    %10 = arith.divf %8, %9 : vector<128x128xf32>
    %11 = arith.mulf %3, %10 : vector<128x128xf32>
    %12 = arith.truncf %11 : vector<128x128xf32> to vector<128x128xbf16>
    %c0_4 = arith.constant 0 : index
    %c0_5 = arith.constant 0 : index
    %13 = vector.load %arg3[%c0_4, %c0_5] : memref<128x128xbf16, #tpu.memory_space<vmem>>, vector<128x128xbf16>
    %cst_6 = arith.constant dense<0.000000e+00> : vector<128x128xf32>
    %14 = tpu.matmul %12, %13, %cst_6 {dimension_numbers = #tpu.dot_dimension_numbers<[1], [0], [0], [1], [0, 0, 1, 1], [], []>} : vector<128x128xbf16>, vector<128x128xbf16>, vector<128x128xf32> -> vector<128x128xf32>
    %15 = arith.addf %4, %14 : vector<128x128xf32>
    %16 = arith.negf %15 : vector<128x128xf32>
    %17 = math.exp %16 : vector<128x128xf32>
    %cst_7 = arith.constant 1.000000e+00 : f32
    %18 = vector.broadcast %cst_7 : f32 to vector<128x128xf32>
    %19 = arith.addf %18, %17 : vector<128x128xf32>
    %20 = arith.divf %18, %19 : vector<128x128xf32>
    %21 = arith.mulf %15, %20 : vector<128x128xf32>
    %22 = arith.truncf %21 : vector<128x128xf32> to vector<128x128xbf16>
    %c0_8 = arith.constant 0 : index
    %c0_9 = arith.constant 0 : index
    %23 = vector.load %arg4[%c0_8, %c0_9] : memref<128x128xbf16, #tpu.memory_space<vmem>>, vector<128x128xbf16>
    %cst_10 = arith.constant dense<0.000000e+00> : vector<128x128xf32>
    %24 = tpu.matmul %22, %23, %cst_10 {dimension_numbers = #tpu.dot_dimension_numbers<[1], [0], [0], [1], [0, 0, 1, 1], [], []>} : vector<128x128xbf16>, vector<128x128xbf16>, vector<128x128xf32> -> vector<128x128xf32>
    %25 = arith.addf %5, %24 : vector<128x128xf32>
    %c0_11 = arith.constant 0 : index
    %c0_12 = arith.constant 0 : index
    %26 = vector.load %arg5[%c0_11, %c0_12] : memref<1x128xf32, #tpu.memory_space<vmem>>, vector<1x128xf32>
    %cst_13 = arith.constant 5.000000e-01 : f32
    %27 = vector.broadcast %cst_13 : f32 to vector<1x128xf32>
    %28 = arith.cmpf ogt, %26, %27 : vector<1x128xf32>
    %29 = arith.negf %25 : vector<128x128xf32>
    %30 = math.exp %29 : vector<128x128xf32>
    %cst_14 = arith.constant 1.000000e+00 : f32
    %31 = vector.broadcast %cst_14 : f32 to vector<128x128xf32>
    %32 = arith.addf %31, %30 : vector<128x128xf32>
    %33 = arith.divf %31, %32 : vector<128x128xf32>
    %34 = vector.shape_cast %28 : vector<1x128xi1> to vector<1x128xi1>
    %35 = vector.broadcast %34 : vector<1x128xi1> to vector<128x128xi1>
    %36 = arith.select %35, %33, %25 : vector<128x128xi1>, vector<128x128xf32>
    %c0_15 = arith.constant 0 : index
    %c0_16 = arith.constant 0 : index
    %37 = vector.load %arg6[%c0_15, %c0_16] : memref<128x128xf32, #tpu.memory_space<vmem>>, vector<128x128xf32>
    tpu.vector_store %arg6[%c0_15, %c0_16], %36 {strides = array<i32>} : memref<128x128xf32, #tpu.memory_space<vmem>>, vector<128x128xf32>,
    return
  }
  func.func @transform_0(%arg0: i32) -> (i32, i32) {
    %c0_i32 = arith.constant 0 : i32
    %c0_i32_0 = arith.constant 0 : i32
    return %arg0, %c0_i32 : i32, i32
  }
  func.func @transform_1(%arg0: i32) -> (i32, i32) {
    %c0_i32 = arith.constant 0 : i32
    %c0_i32_0 = arith.constant 0 : i32
    %c0_i32_1 = arith.constant 0 : i32
    return %c0_i32, %c0_i32_0 : i32, i32
  }
  func.func @transform_2(%arg0: i32) -> (i32, i32) {
    %c0_i32 = arith.constant 0 : i32
    %c0_i32_0 = arith.constant 0 : i32
    %c0_i32_1 = arith.constant 0 : i32
    return %c0_i32, %c0_i32_0 : i32, i32
  }
  func.func @transform_3(%arg0: i32) -> (i32, i32) {
    %c0_i32 = arith.constant 0 : i32
    %c0_i32_0 = arith.constant 0 : i32
    %c0_i32_1 = arith.constant 0 : i32
    return %c0_i32, %c0_i32_0 : i32, i32
  }
  func.func @transform_4(%arg0: i32) -> (i32, i32) {
    %c0_i32 = arith.constant 0 : i32
    %c0_i32_0 = arith.constant 0 : i32
    %c0_i32_1 = arith.constant 0 : i32
    return %c0_i32, %c0_i32_0 : i32, i32
  }
  func.func @transform_5(%arg0: i32) -> (i32, i32) {
    %c0_i32 = arith.constant 0 : i32
    %c0_i32_0 = arith.constant 0 : i32
    return %arg0, %c0_i32 : i32, i32
  }
}

</mosaic_0001>

<bundles_post_ra>
// kernel: tpu_custom_call.1
= control target key start
LH: loop header
LB: loop body
LE: loop exit
PB: predicated region body
PF: predicated region fallthrough
CT: control target
= control target key end

     0   :  { %10 = vsyncpa [#allocation3], 0  ;;  %s2877_s0 = inlined_call_operand.hbm [shape: bf16[512,128], index: 0, kind: input, shape index: {}]   ;;  %s2878_s1 = inlined_call_operand.hbm [shape: bf16[128,384], index: 1, kind: input, shape index: {}]   ;;  %s2879_s2 = inlined_call_operand.hbm [shape: bf16[128,128], index: 2, kind: input, shape index: {}]   ;;  %s2880_s3 = inlined_call_operand.hbm [shape: bf16[128,128], index: 3, kind: input, shape index: {}]   ;;  %s2881_s4 = inlined_call_operand.vmem [shape: f32[1,128], index: 4, kind: input, shape index: {}]   ;;  %s2882_s5 = inlined_call_operand.hbm [shape: f32[512,128], index: 5, kind: output, shape index: {}]  }
   0x1   :  { %12 = vsyncpa [#allocation3 + $0x1], 0 }
   0x2   :  { %13 = vsyncpa [#allocation6], 0 }
   0x3   :  { %14 = vsyncpa [#allocation9], 0 }
   0x4   :  { %15 = vsyncpa [#allocation4], 0 }
   0x5   :  { %17 = vsyncpa [#allocation4 + $0x1], 0  ;;  %s2428_s18 = smov 0   ;;  %s2430_s19 = smov 0  }
   0x6   :  { %s2432_s20 = smov 0   ;;  %s2434_s21 = smov 0  }
   0x7 LB: > { %s2449_s22 = sadd.s32 4294967295, %s2384_s21   ;;  %s1570_s23 = sadd.s32 4294967294, %s2384_s21   ;;  %s2384_s21 = sphi %s2434_s21, %s2904_s21   ;;  %s2380_s20 = sphi %s2432_s20, %s2903_s20   ;;  %s2376_s19 = sphi %s2430_s19, %s2902_s19   ;;  %s2372_s18 = sphi %s2428_s18, %s2901_s18  }
   0x8   : > { %p43_p0 = scmp.ne.s32.totalorder %s2376_s19, %s2372_s18  ;;  %p2883_p1 = scmp.eq.s32.totalorder %s2449_s22, 0 }
   0x9   : > { %p157_p3 = scmp.eq.s32.totalorder %s1570_s23, 3  ;;  %p1571_p5 = scmp.ge.s32.totalorder %s2384_s21, 1 }
   0xa   : > { %p2458_p4 = por %p2883_p1, %p43_p0  ;;  %p164_p7 = scmp.lt.s32.totalorder %s2384_s21, 5 }
   0xb   : > { %p2463_p6 = por %p157_p3, %p43_p0  ;;  %s2386_s27 = smov [#allocation5]  }
   0xc   : > { %s2886_s24 = scalar_select %p2458_p4, 1, 0 }
   0xd   : > { %s2887_s25 = scalar_select %p2463_p6, 1, 0 }
   0xe   : > { %p2468_p8 = pnand %p1571_p5, %p164_p7  ;;  %s176_s28 = sshll.u32 %s2386_s27, 4  ;;  %s177_s28 = int_to_ptr.vmem [resolvable:$true] %s176_s28 }
   0xf   : > { %s2387_s30 = smov [#allocation7]   ;;  %s2196_s9 = scalar_lea.hbm %s2878_s1, 3072 }
  0x10   : > { %s2888_s26 = scalar_select %p2468_p8, 1, 0 }
  0x11   : > { %p1880_p9 = pneg %p2468_p8  ;;  %s189_s6 = sshll.u32 %s2387_s30, 4  ;;  %s2480_s6 = int_to_ptr.vmem [resolvable:$true] %s189_s6 }
  0x12   : > { %p2197_p11 = scmp.ne.s32.totalorder %s2878_s1, %s2196_s9  ;;  %p2203_p3 = scmp.lt.u32.totalorder %s2196_s9, %s2878_s1 }
  0x13   : > { %p2476_p10 = pnand %p1880_p9, %p2883_p1 }
  0x15   : > { %p2490_p12 = pneg %p2476_p10 }
  0x17   : > { %p2199_p13 = pnand %p2490_p12, %p2197_p11 }
  0x19   : > { %p2200_p0 = pneg %p2199_p13 }
  0x1b   : > { %p2205_p5 = pnand %p2203_p3, %p2200_p0 }
  0x1d   : > { %2208 = shalt.err (!%p2205_p5)
}
  0x1e   : > { %s2209_s15 = scalar_lea.vmem %s177_s28, 3072  ;;  %p2217_p2 = scmp.lt.s32.totalorder %s177_s28, %s177_s28 }
  0x1f   : > { %p2210_p7 = scmp.ne.s32.totalorder %s177_s28, %s2209_s15  ;;  %p2218_p6 = scmp.lt.s32.totalorder %s2209_s15, %s2209_s15 }
  0x21   : > { %p2212_p9 = pnand %p2210_p7, %p2490_p12  ;;  %p2219_p4 = por %p2218_p6, %p2217_p2 }
  0x23   : > { %p2213_p1 = pneg %p2212_p9 }
  0x25   : > { %p2220_p8 = pnand %p2219_p4, %p2213_p1 }
  0x27   : > { %2223 = shalt.err (!%p2220_p8)
}
  0x28   : > { %s2388_s16 = smov 192   ;;  %s2389_s17 = smov 12  }
  0x29   : > { %1883 = dma.hbm_to_vmem [thread:$0]  (!%p2476_p10), %s2878_s1, 3072, %s177_s28, [#allocation6], %s2388_s16, %s2388_s16, %s2389_s17  }
  0x2a   : > { %s2224_s8 = scalar_lea.hbm %s2879_s2, 1024 }
  0x2b   : > { %p2225_p11 = scmp.ne.s32.totalorder %s2879_s2, %s2224_s8  ;;  %p2231_p4 = scmp.lt.u32.totalorder %s2224_s8, %s2879_s2 }
  0x2d   : > { %p2227_p1 = pnand %p2225_p11, %p2490_p12 }
  0x2f   : > { %p2228_p2 = pneg %p2227_p1 }
  0x31   : > { %p2233_p6 = pnand %p2231_p4, %p2228_p2 }
  0x33   : > { %2236 = shalt.err (!%p2233_p6)
}
  0x34   : > { %s2237_s28 = scalar_lea.vmem %s2480_s6, 1024  ;;  %p2245_p3 = scmp.lt.s32.totalorder %s2480_s6, %s2480_s6 }
  0x35   : > { %p2238_p8 = scmp.ne.s32.totalorder %s2480_s6, %s2237_s28  ;;  %p2246_p5 = scmp.lt.s32.totalorder %s2237_s28, %s2237_s28 }
  0x37   : > { %p2240_p13 = pnand %p2238_p8, %p2490_p12  ;;  %p2247_p7 = por %p2246_p5, %p2245_p3 }
  0x39   : > { %p2241_p0 = pneg %p2240_p13 }
  0x3b   : > { %p2248_p9 = pnand %p2247_p7, %p2241_p0 }
  0x3d   : > { %2251 = shalt.err (!%p2248_p9)
}
  0x3e   : > { %s2390_s14 = smov 64   ;;  %s2391_s15 = smov 4  }
  0x3f   : > { %1886 = dma.hbm_to_vmem [thread:$0]  (!%p2476_p10), %s2879_s2, 1024, %s2480_s6, [#allocation6], %s2390_s14, %s2390_s14, %s2391_s15  }
  0x40   : > { %s2392_s23 = smov [#allocation8]   ;;  %s2533_s30 = sadd.s32 1, %s2384_s21  }
  0x41   : > { %s202_s27 = sshll.u32 %s2392_s23, 4  ;;  %s2252_s9 = scalar_lea.hbm %s2880_s3, 1024  ;;  %s203_s27 = int_to_ptr.vmem [resolvable:$true] %s202_s27 }
  0x42   : > { %p2253_p11 = scmp.ne.s32.totalorder %s2880_s3, %s2252_s9  ;;  %p2259_p4 = scmp.lt.u32.totalorder %s2252_s9, %s2880_s3 }
  0x44   : > { %p2255_p1 = pnand %p2253_p11, %p2490_p12 }
  0x46   : > { %p2256_p2 = pneg %p2255_p1 }
  0x48   : > { %p2261_p6 = pnand %p2259_p4, %p2256_p2 }
  0x4a   : > { %2264 = shalt.err (!%p2261_p6)
}
  0x4b   : > { %s2265_s6 = scalar_lea.vmem %s203_s27, 1024  ;;  %p2273_p3 = scmp.lt.s32.totalorder %s203_s27, %s203_s27 }
  0x4c   : > { %p2266_p8 = scmp.ne.s32.totalorder %s203_s27, %s2265_s6  ;;  %p2274_p5 = scmp.lt.s32.totalorder %s2265_s6, %s2265_s6 }
  0x4e   : > { %p2268_p13 = pnand %p2266_p8, %p2490_p12  ;;  %p2275_p7 = por %p2274_p5, %p2273_p3 }
  0x50   : > { %p2269_p0 = pneg %p2268_p13 }
  0x52   : > { %p2276_p9 = pnand %p2275_p7, %p2269_p0 }
  0x54   : > { %2279 = shalt.err (!%p2276_p9)
}
  0x55   : > { %1889 = dma.hbm_to_vmem [thread:$0]  (!%p2476_p10), %s2880_s3, 1024, %s203_s27, [#allocation9], %s2390_s14, %s2390_s14, %s2391_s15  }
  0x56   : > { %s27_s12 = ssub.s32 %s2384_s21, %s2533_s30  ;;  %s30_s29 = sadd.s32 1, %s2380_s20 }
  0x57   : > { %p28_p12 = scmp.eq.s32.totalorder %s27_s12, 0  ;;  %p37_p11 = scmp.ne.s32.totalorder %s2380_s20, %s2376_s19 }
  0x58   : > { %p38_p1 = scmp.eq.s32.totalorder %s2384_s21, 0  ;;  %p1901_p2 = scmp.lt.s32.totalorder %s2384_s21, 4 }
  0x59   : > { %s2564_s23 = scalar_select %p28_p12, %s2380_s20, %s30_s29  }
  0x5a   : > { %p39_p4 = por %p38_p1, %p37_p11  ;;  %p2891_p6 = scmp.eq.s32.totalorder %s2449_s22, 3 }
  0x5b   : > { %s219_s8 = sand.u32 1, %s2380_s20   ;;  %s1686_s9 = sshll.u32 %s2384_s21, 10 }
  0x5c   : > { %p2568_p8 = por %p2891_p6, %p37_p11  ;;  %s1576_s10 = sshll.u32 %s219_s8, 6 }
  0x5d   : > { %s2577_s27 = scalar_lea.hbm %s2877_s0, %s1686_s9  ;;  %s223_s28 = scalar_lea.vmem [#allocation2], %s1576_s10 }
  0x5e   : > { %s230_s6 = sshll.u32 %s223_s28, 4  ;;  %p2579_p10 = pnand %p1901_p2, %p39_p4  ;;  %s2583_s6 = int_to_ptr.vmem [resolvable:$true] %s230_s6 }
  0x5f   : > { %s2585_s17 = scalar_lea.sflag [#allocation3], %s219_s8  ;;  %s2280_s12 = scalar_lea.hbm %s2577_s27, 1024 }
  0x60   : > { %p2281_p13 = scmp.ne.s32.totalorder %s2577_s27, %s2280_s12  ;;  %p2282_p0 = pneg %p2579_p10 }
  0x61   : > { %s2285_s10 = scalar_lea.hbm %s2877_s0, 4096  ;;  %p2286_p7 = scmp.lt.u32.totalorder %s2577_s27, %s2877_s0 }
  0x62   : > { %p2283_p3 = pnand %p2282_p0, %p2281_p13  ;;  %p2287_p9 = scmp.lt.u32.totalorder %s2285_s10, %s2280_s12 }
  0x63   : > { %p2289_p11 = scmp.lt.u32.totalorder %s2280_s12, %s2577_s27 }
  0x64   : > { %p2284_p5 = pneg %p2283_p3  ;;  %p2288_p12 = por %p2287_p9, %p2286_p7 }
  0x66   : > { %p2290_p1 = por %p2289_p11, %p2288_p12 }
  0x68   : > { %p2291_p2 = pnand %p2290_p1, %p2284_p5 }
  0x6a   : > { %2294 = shalt.err (!%p2291_p2)
}
  0x6b   : > { %s2295_s8 = scalar_lea.vmem %s2583_s6, 1024  ;;  %s2393_s28 = smov [#allocation2]  }
  0x6c   : > { %p2296_p4 = scmp.ne.s32.totalorder %s2583_s6, %s2295_s8  ;;  %s2300_s29 = sshll.u32 %s2393_s28, 4  ;;  %s2301_s29 = int_to_ptr.vmem [resolvable:$false] %s2300_s29 }
  0x6d   : > { %s2302_s9 = scalar_lea.vmem %s2301_s29, 2048  ;;  %p2303_p3 = scmp.lt.s32.totalorder %s2583_s6, %s2301_s29 }
  0x6e   : > { %p2298_p6 = pnand %p2296_p4, %p2282_p0  ;;  %p2304_p7 = scmp.lt.s32.totalorder %s2302_s9, %s2295_s8 }
  0x70   : > { %p2299_p13 = pneg %p2298_p6  ;;  %p2305_p9 = por %p2304_p7, %p2303_p3 }
  0x72   : > { %p2306_p12 = pnand %p2305_p9, %p2299_p13 }
  0x74   : > { %2309 = shalt.err (!%p2306_p12)
}
  0x75   : > { %1893 = dma.hbm_to_vmem [thread:$0]  (!%p2579_p10), %s2577_s27, 1024, %s2583_s6, %s2585_s17, %s2390_s14, %s2390_s14, %s2391_s15  }
  0x76   : > { %p2894_p0 = scmp.ne.s32.totalorder %s2888_s26, 0 }
  0x77   : > { %s2619_s12 = sand.u32 (!%p2894_p0), 1, %s2376_s19   ;;  %p2895_p5 = scmp.ne.s32.totalorder (!%p2894_p0), %s2886_s24, 0 }
  0x78   : > { %242 = sbr.rel (%p2894_p0) target bundleno = 977 (0x3d1), region = 40  ;;  %s1580_s10 = sshll.u32 (!%p2894_p0), %s2619_s12, 6 }
  0x79   : > { %s245_s11 = scalar_lea.sflag (!%p2894_p0), [#allocation3], %s2619_s12  ;;  %s2623_s13 = scalar_lea.vmem (!%p2894_p0), [#allocation2], %s1580_s10 }
  0x7f   : > { %2355 = dma.done.wait (%p2895_p5), %s245_s11, 1024  }
  0x80   : > { %2357 = vsyncadd (%p2895_p5), %s245_s11, 4294966272  ;;  %p2896_p10 = scmp.eq.s32.totalorder %s2449_s22, 0 }
  0x82   : > { %2359 = dma.done.wait (%p2896_p10), [#allocation6], 4096   ;;  %p2897_p11 = pmov %p2896_p10 }
  0x83   : > { %p2898_p1 = pmov %p2896_p10 }
  0x84   : > { %2361 = vsyncadd (%p2897_p11), [#allocation6], 4294963200 }
  0x85   : > { %2363 = dma.done.wait (%p2898_p1), [#allocation9], 1024   ;;  %p2899_p2 = pmov %p2898_p1 }
  0x86   : > { %v2394_v0 = vmov 0   ;;  %v1948_v1 = vld [vmem:[#allocation5 + $0x4] ss:$12 sps:$4 sm:$0xff]   ;;  %v1950_v2 = vld [vmem:[#allocation5] ss:$12 sps:$4 sm:$0xff]   ;;  %v1975_v26 = vld [vmem:[%s2623_s13 + $0x18] sm:$0xff]  }
  0x87   : > { %2365 = vsyncadd (%p2899_p2), [#allocation9], 4294966272  ;;  %546 = vmatprep.mubr.bf16.mxu0 %v2394_v0  ;;  %514 = vmatprep.subr.bf16.mxu0 %v1948_v1  ;;  %v1951_v3 = vld [vmem:[#allocation5 + $0x1c] ss:$12 sps:$4 sm:$0xff]   ;;  %v1953_v4 = vld [vmem:[#allocation5 + $0x18] ss:$12 sps:$4 sm:$0xff]  }
  0x88   : > { %515 = vmatpush1.bf16.msra.mxu0 %v1950_v2  ;;  %v1954_v5 = vld [vmem:[#allocation5 + $0x34] ss:$12 sps:$4 sm:$0xff]   ;;  %v1956_v6 = vld [vmem:[#allocation5 + $0x30] ss:$12 sps:$4 sm:$0xff]   ;;  %v1957_v7 = vld [vmem:[#allocation5 + $0x4c] ss:$12 sps:$4 sm:$0xff]  }
  0x89   : > { %516 = vmatprep.subr.bf16.mxu0 %v1951_v3  ;;  %v1959_v8 = vld [vmem:[#allocation5 + $0x48] ss:$12 sps:$4 sm:$0xff]   ;;  %v1972_v9 = vld [vmem:[%s2623_s13] sm:$0xff]   ;;  %v1968_v17 = vld [vmem:[#allocation5 + $0x90] ss:$12 sps:$4 sm:$0xff]   ;;  %s1584_s14 = sshll.u32 %s2619_s12, 7 }
  0x8a   : > { %v1960_v10 = vld [vmem:[#allocation5 + $0x64] ss:$12 sps:$4 sm:$0xff]   ;;  %1752 = vmatprep.mubr.bf16.mxu1 %v1972_v9  ;;  %v1962_v11 = vld [vmem:[#allocation5 + $0x60] ss:$12 sps:$4 sm:$0xff]   ;;  %v1963_v12 = vld [vmem:[#allocation5 + $0x7c] ss:$12 sps:$4 sm:$0xff]  }
  0x8b   : > { %v1965_v13 = vld [vmem:[#allocation5 + $0x78] ss:$12 sps:$4 sm:$0xff]   ;;  %v1966_v14 = vld [vmem:[#allocation5 + $0x94] ss:$12 sps:$4 sm:$0xff]   ;;  %v1983_v21 = vld [vmem:[#allocation5 + $0x50] ss:$12 sps:$4 sm:$0xff]  }
  0x8c   : > { %517 = vmatpush1.bf16.msra.mxu0 %v1953_v4  ;;  %v1980_v15 = vld [vmem:[#allocation5 + $0x8] ss:$12 sps:$4 sm:$0xff]   ;;  %v1981_v16 = vld [vmem:[#allocation5 + $0x20] ss:$12 sps:$4 sm:$0xff]   ;;  %v1982_v18 = vld [vmem:[#allocation5 + $0x38] ss:$12 sps:$4 sm:$0xff]  }
  0x8d   : > { %518 = vmatprep.subr.bf16.mxu0 %v1954_v5  ;;  %1736 = vmatprep.subr.bf16.mxu1 %v1980_v15  ;;  %v1969_v19 = vld [vmem:[#allocation5 + $0xac] ss:$12 sps:$4 sm:$0xff]   ;;  %v1971_v20 = vld [vmem:[#allocation5 + $0xa8] ss:$12 sps:$4 sm:$0xff]   ;;  %v1976_v27 = vld [vmem:[%s2623_s13 + $0x20] sm:$0xff]   ;;  %s2778_s15 = scalar_lea.vmem [#allocation10], %s1584_s14 }
  0x8e   : > { %1737 = vmatpush3.bf16.msra.mxu1 %v1980_v15  ;;  %v1984_v22 = vld [vmem:[#allocation5 + $0x68] ss:$12 sps:$4 sm:$0xff]   ;;  %v1985_v23 = vld [vmem:[#allocation5 + $0x80] ss:$12 sps:$4 sm:$0xff]   ;;  %v1979_v30 = vld [vmem:[%s2623_s13 + $0x38] sm:$0xff]   ;;  %s1687_s27 = sshll.u32 %s2449_s22, 11 }
  0x8f   : > { %1738 = vmatprep.subr.bf16.mxu1 %v1981_v16  ;;  %v1973_v24 = vld [vmem:[%s2623_s13 + $0x8] sm:$0xff]   ;;  %v1974_v25 = vld [vmem:[%s2623_s13 + $0x10] sm:$0xff]   ;;  %v1986_v31 = vld [vmem:[#allocation5 + $0x98] ss:$12 sps:$4 sm:$0xff]   ;;  %s1468_s6 = sshll.u32 %s2778_s15, 4  ;;  %s2825_s8 = scalar_lea.hbm %s2882_s5, %s1687_s27  ;;  %s2827_s6 = int_to_ptr.vmem [resolvable:$true] %s1468_s6 }
  0x90   : > { %519 = vmatpush1.bf16.msra.mxu0 %v1956_v6  ;;  %v1977_v28 = vld [vmem:[%s2623_s13 + $0x28] sm:$0xff]   ;;  %v1978_v29 = vld [vmem:[%s2623_s13 + $0x30] sm:$0xff]   ;;  %v1988_v33 = vld [vmem:[#allocation7] sm:$0xff]   ;;  %s1455_s22 = scalar_lea.sflag [#allocation4], %s2619_s12  ;;  %s2310_s28 = scalar_lea.vmem %s2827_s6, 2048 }
  0x91   : > { %520 = vmatprep.subr.bf16.mxu0 %v1957_v7  ;;  %v1987_v32 = vld [vmem:[#allocation5 + $0xb0] ss:$12 sps:$4 sm:$0xff]   ;;  %v1989_v34 = vld [vmem:[#allocation7 + $0x8] sm:$0xff]   ;;  %v1992_v37 = vld [vmem:[#allocation7 + $0x20] sm:$0xff]   ;;  %p2311_p4 = scmp.ne.s32.totalorder %s2827_s6, %s2310_s28  ;;  %s2395_s29 = smov [#allocation10]  }
  0x92   : > { %1739 = vmatpush3.bf16.msra.mxu1 %v1981_v16  ;;  %v1990_v35 = vld [vmem:[#allocation7 + $0x10] sm:$0xff]   ;;  %v1991_v36 = vld [vmem:[#allocation7 + $0x18] sm:$0xff]   ;;  %v1993_v38 = vld [vmem:[#allocation7 + $0x28] sm:$0xff]   ;;  %s2314_s9 = sshll.u32 %s2395_s29, 4  ;;  %s2315_s9 = int_to_ptr.vmem [resolvable:$false] %s2314_s9 }
  0x93   : > { %1740 = vmatprep.subr.bf16.mxu1 %v1982_v18  ;;  %v1994_v39 = vld [vmem:[#allocation7 + $0x30] sm:$0xff]   ;;  %v1995_v40 = vld [vmem:[#allocation7 + $0x38] sm:$0xff]   ;;  %p2312_p6 = pnand %p2311_p4, %p2568_p8  ;;  %s2316_s10 = scalar_lea.vmem %s2315_s9, 4096 }
  0x94   : > { %521 = vmatpush1.bf16.msra.mxu0 %v1959_v8  ;;  %p2317_p3 = scmp.lt.s32.totalorder %s2827_s6, %s2315_s9  ;;  %p2318_p7 = scmp.lt.s32.totalorder %s2316_s10, %s2310_s28 }
  0x95   : > { %522 = vmatprep.subr.bf16.mxu0 %v1960_v10  ;;  %p2313_p13 = pneg %p2312_p6 }
  0x96   : > { %1741 = vmatpush3.bf16.msra.mxu1 %v1982_v18  ;;  %p2319_p9 = por %p2318_p7, %p2317_p3 }
  0x97   : > { %1742 = vmatprep.subr.bf16.mxu1 %v1983_v21 }
  0x98   : > { %523 = vmatpush1.bf16.msra.mxu0 %v1962_v11  ;;  %p2320_p12 = pnand %p2319_p9, %p2313_p13 }
  0x99   : > { %524 = vmatprep.subr.bf16.mxu0 %v1963_v12 }
  0x9a   : > { %1743 = vmatpush3.bf16.msra.mxu1 %v1983_v21 }
  0x9b   : > { %1744 = vmatprep.subr.bf16.mxu1 %v1984_v22 }
  0x9c   : > { %525 = vmatpush1.bf16.msra.mxu0 %v1965_v13 }
  0x9d   : > { %526 = vmatprep.subr.bf16.mxu0 %v1966_v14 }
  0x9e   : > { %1745 = vmatpush3.bf16.msra.mxu1 %v1984_v22 }
  0x9f   : > { %1746 = vmatprep.subr.bf16.mxu1 %v1985_v23 }
  0xa0   : > { %527 = vmatpush1.bf16.msra.mxu0 %v1968_v17 }
  0xa1   : > { %528 = vmatprep.subr.bf16.mxu0 %v1969_v19 }
  0xa2   : > { %1747 = vmatpush3.bf16.msra.mxu1 %v1985_v23 }
  0xa3   : > { %1748 = vmatprep.subr.bf16.mxu1 %v1986_v31 }
  0xa4   : > { %529 = vmatpush1.bf16.msra.mxu0 %v1971_v20 }
  0xa6   : > { %1749 = vmatpush3.bf16.msra.mxu1 %v1986_v31 }
  0xa7   : > { %547 = vmatmul.mubr.bf16.vlgmr.msra.gmra.mrb[0].mxu0 %v1972_v9  ;;  %1750 = vmatprep.subr.bf16.mxu1 %v1987_v32 }
  0xa8   : > { %556 = vmatprep.mubr.bf16.mxu0 %v2394_v0 }
  0xaa   : > { %1751 = vmatpush3.bf16.msra.mxu1 %v1987_v32 }
  0xab   : > { %1768 = vmatprep.subr.bf16.mxu1 %v1988_v33 }
  0xad   : > { %1753 = vmatmul.mubr.bf16.vlgmr.msra.gmra.mrb[0].mxu1 %v1973_v24 }
  0xae   : > { %1756 = vmatprep.mubr.bf16.mxu1 %v1974_v25  ;;  %1769 = vmatpush3.bf16.msra.mxu1 %v1988_v33 }
  0xaf   : > { %557 = vmatmul.mubr.bf16.gmra.mrb[4].mxu0 %v1973_v24  ;;  %1770 = vmatprep.subr.bf16.mxu1 %v1989_v34 }
  0xb0   : > { %566 = vmatprep.mubr.bf16.mxu0 %v2394_v0 }
  0xb2   : > { %1771 = vmatpush3.bf16.msra.mxu1 %v1989_v34 }
  0xb3   : > { %1772 = vmatprep.subr.bf16.mxu1 %v1990_v35 }
  0xb5   : > { %1757 = vmatmul.mubr.bf16.gmra.mrb[4].mxu1 %v1975_v26 }
  0xb6   : > { %1760 = vmatprep.mubr.bf16.mxu1 %v1976_v27  ;;  %1773 = vmatpush3.bf16.msra.mxu1 %v1990_v35 }
  0xb7   : > { %567 = vmatmul.mubr.bf16.gmra.mrb[8].mxu0 %v1974_v25  ;;  %1774 = vmatprep.subr.bf16.mxu1 %v1991_v36 }
  0xb8   : > { %576 = vmatprep.mubr.bf16.mxu0 %v2394_v0 }
  0xba   : > { %1775 = vmatpush3.bf16.msra.mxu1 %v1991_v36 }
  0xbb   : > { %1776 = vmatprep.subr.bf16.mxu1 %v1992_v37 }
  0xbd   : > { %1761 = vmatmul.mubr.bf16.gmra.mrb[8].mxu1 %v1977_v28 }
  0xbe   : > { %1764 = vmatprep.mubr.bf16.mxu1 %v1978_v29  ;;  %1777 = vmatpush3.bf16.msra.mxu1 %v1992_v37 }
  0xbf   : > { %577 = vmatmul.mubr.bf16.gmra.mrb[12].mxu0 %v1975_v26  ;;  %1778 = vmatprep.subr.bf16.mxu1 %v1993_v38 }
  0xc0   : > { %586 = vmatprep.mubr.bf16.mxu0 %v2394_v0 }
  0xc2   : > { %1779 = vmatpush3.bf16.msra.mxu1 %v1993_v38 }
  0xc3   : > { %1780 = vmatprep.subr.bf16.mxu1 %v1994_v39 }
  0xc5   : > { %1765 = vmatmul.mubr.bf16.gmra.mrb[12].mxu1 %v1979_v30 }
  0xc6   : > { %1781 = vmatpush3.bf16.msra.mxu1 %v1994_v39 }
  0xc7   : > { %587 = vmatmul.mubr.bf16.gmra.mrb[16].mxu0 %v1976_v27  ;;  %1782 = vmatprep.subr.bf16.mxu1 %v1995_v40 }
  0xc8   : > { %596 = vmatprep.mubr.bf16.mxu0 %v2394_v0 }
  0xca   : > { %1783 = vmatpush3.bf16.msra.mxu1 %v1995_v40 }
  0xcf   : > { %597 = vmatmul.mubr.bf16.gmra.mrb[20].mxu0 %v1977_v28 }
  0xd0   : > { %606 = vmatprep.mubr.bf16.mxu0 %v2394_v0 }
  0xd7   : > { %607 = vmatmul.mubr.bf16.gmra.mrb[24].mxu0 %v1978_v29 }
  0xd8   : > { %616 = vmatprep.mubr.bf16.mxu0 %v2394_v0 }
  0xdf   : > { %617 = vmatmul.mubr.bf16.gmra.mrb[28].mxu0 %v1979_v30 }
 0x17a   : > { %v548_v41 = vpop.f32.mrb[0].mxu0 }
 0x17b   : > { %v1617_v42 = vmul.f32 -1.442695, %v548_v41  ;;  %v2653_v43 = vpop.f32.mrb[1].mxu0 }
 0x17c   : > { %v552_v44 = vpop.f32.mrb[2].mxu0 }
 0x17d   : > { %2004 = vpow2.f32 %v1617_v42  ;;  %v1618_v45 = vmul.f32 -1.442695, %v552_v44  ;;  %v2655_v46 = vpop.f32.mrb[3].mxu0 }
 0x17f   : > { %2006 = vpow2.f32 %v1618_v45 }
 0x182   : > { %v558_v47 = vpop.f32.mrb[4].mxu0 }
 0x183   : > { %v1619_v48 = vmul.f32 -1.442695, %v558_v47  ;;  %v2657_v49 = vpop.f32.mrb[5].mxu0 }
 0x184   : > { %v562_v50 = vpop.f32.mrb[6].mxu0 }
 0x185   : > { %2008 = vpow2.f32 %v1619_v48  ;;  %v1620_v51 = vmul.f32 -1.442695, %v562_v50  ;;  %v2659_v52 = vpop.f32.mrb[7].mxu0 }
 0x187   : > { %v2005_v53 = vpop.eup %2004  ;;  %2010 = vpow2.f32 %v1620_v51 }
 0x188   : > { %v772_v54 = vadd.f32 1.0, %v2005_v53 }
 0x189   : > { %v2007_v55 = vpop.eup %2006 }
 0x18a   : > { %2012 = vrcp.f32 %v772_v54  ;;  %v773_v56 = vadd.f32 1.0, %v2007_v55  ;;  %v2661_v57 = vpop.f32.mrb[8].mxu0 }
 0x18b   : > { %v1621_v58 = vmul.f32 -1.442695, %v2661_v57  ;;  %v2664_v59 = vpop.f32.mrb[9].mxu0 }
 0x18c   : > { %2014 = vrcp.f32 %v773_v56  ;;  %v572_v60 = vpop.f32.mrb[10].mxu0 }
 0x18d   : > { %2016 = vpow2.f32 %v1621_v58  ;;  %v1622_v61 = vmul.f32 -1.442695, %v572_v60  ;;  %v2666_v62 = vpop.f32.mrb[11].mxu0 }
 0x18f   : > { %v2009_v63 = vpop.eup %2008  ;;  %2018 = vpow2.f32 %v1622_v61 }
 0x190   : > { %v774_v1 = vadd.f32 1.0, %v2009_v63 }
 0x191   : > { %v2011_v2 = vpop.eup %2010 }
 0x192   : > { %2020 = vrcp.f32 %v774_v1  ;;  %v775_v3 = vadd.f32 1.0, %v2011_v2  ;;  %v2668_v4 = vpop.f32.mrb[12].mxu0 }
 0x193   : > { %v1623_v5 = vmul.f32 -1.442695, %v2668_v4  ;;  %v2671_v6 = vpop.f32.mrb[13].mxu0 }
 0x194   : > { %v2013_v7 = vpop.eup %2012  ;;  %2022 = vrcp.f32 %v775_v3  ;;  %v2673_v8 = vpop.f32.mrb[14].mxu0 }
 0x195   : > { %2024 = vpow2.f32 %v1623_v5  ;;  %v1624_v9 = vmul.f32 -1.442695, %v2673_v8  ;;  %v2676_v10 = vpop.f32.mrb[15].mxu0  ;;  %v820_v13 = vmul.f32 %v2013_v7, %v548_v41 }
 0x196   : > { %v2015_v11 = vpop.eup %2014 }
 0x197   : > { %v2017_v12 = vpop.eup %2016  ;;  %v821_v14 = vmul.f32 %v2015_v11, %v552_v44  ;;  %2026 = vpow2.f32 %v1624_v9 }
 0x198   : > { %v776_v15 = vadd.f32 1.0, %v2017_v12 }
 0x199   : > { %v2019_v16 = vpop.eup %2018  ;;  %v836_v17 = vpack.c.bf16 %v821_v14, %v820_v13 }
 0x19a   : > { %2028 = vrcp.f32 %v776_v15  ;;  %v777_v18 = vadd.f32 1.0, %v2019_v16  ;;  %v2678_v19 = vpop.f32.mrb[16].mxu0 }
 0x19b   : > { %v1625_v20 = vmul.f32 -1.442695, %v2678_v19  ;;  %v2681_v21 = vpop.f32.mrb[17].mxu0  ;;  %1784 = vmatprep.mubr.bf16.mxu1 %v836_v17 }
 0x19c   : > { %v2021_v22 = vpop.eup %2020  ;;  %2030 = vrcp.f32 %v777_v18  ;;  %v2683_v23 = vpop.f32.mrb[18].mxu0 }
 0x19d   : > { %2032 = vpow2.f32 %v1625_v20  ;;  %v1626_v24 = vmul.f32 -1.442695, %v2683_v23  ;;  %v2686_v25 = vpop.f32.mrb[19].mxu0  ;;  %v822_v28 = vmul.f32 %v2021_v22, %v558_v47 }
 0x19e   : > { %v2023_v26 = vpop.eup %2022 }
 0x19f   : > { %v2025_v27 = vpop.eup %2024  ;;  %v823_v29 = vmul.f32 %v2023_v26, %v562_v50  ;;  %2034 = vpow2.f32 %v1626_v24 }
 0x1a0   : > { %v778_v30 = vadd.f32 1.0, %v2025_v27 }
 0x1a1   : > { %v2027_v31 = vpop.eup %2026  ;;  %v837_v32 = vpack.c.bf16 %v823_v29, %v822_v28 }
 0x1a2   : > { %2036 = vrcp.f32 %v778_v30  ;;  %v779_v33 = vadd.f32 1.0, %v2027_v31  ;;  %v2688_v34 = vpop.f32.mrb[20].mxu0 }
 0x1a3   : > { %v1627_v35 = vmul.f32 -1.442695, %v2688_v34  ;;  %v2691_v36 = vpop.f32.mrb[21].mxu0  ;;  %1785 = vmatmul.mubr.bf16.vlgmr.msra.gmra.mrb[16].mxu1 %v837_v32 }
 0x1a4   : > { %v2029_v37 = vpop.eup %2028  ;;  %2038 = vrcp.f32 %v779_v33  ;;  %v602_v38 = vpop.f32.mrb[22].mxu0 }
 0x1a5   : > { %2040 = vpow2.f32 %v1627_v35  ;;  %v1628_v39 = vmul.f32 -1.442695, %v602_v38  ;;  %v2693_v40 = vpop.f32.mrb[23].mxu0  ;;  %v824_v44 = vmul.f32 %v2029_v37, %v2661_v57 }
 0x1a6   : > { %v2031_v41 = vpop.eup %2030 }
 0x1a7   : > { %v2033_v42 = vpop.eup %2032  ;;  %v825_v45 = vmul.f32 %v2031_v41, %v572_v60  ;;  %2042 = vpow2.f32 %v1628_v39 }
 0x1a8   : > { %v780_v47 = vadd.f32 1.0, %v2033_v42 }
 0x1a9   : > { %v2035_v48 = vpop.eup %2034  ;;  %v838_v50 = vpack.c.bf16 %v825_v45, %v824_v44 }
 0x1aa   : > { %2044 = vrcp.f32 %v780_v47  ;;  %v781_v51 = vadd.f32 1.0, %v2035_v48  ;;  %v608_v53 = vpop.f32.mrb[24].mxu0 }
 0x1ab   : > { %v1629_v54 = vmul.f32 -1.442695, %v608_v53  ;;  %v2696_v55 = vpop.f32.mrb[25].mxu0  ;;  %1788 = vmatprep.mubr.bf16.mxu1 %v838_v50 }
 0x1ac   : > { %v2037_v56 = vpop.eup %2036  ;;  %2046 = vrcp.f32 %v781_v51  ;;  %v612_v58 = vpop.f32.mrb[26].mxu0 }
 0x1ad   : > { %2048 = vpow2.f32 %v1629_v54  ;;  %v1630_v61 = vmul.f32 -1.442695, %v612_v58  ;;  %v2698_v63 = vpop.f32.mrb[27].mxu0  ;;  %v826_v1 = vmul.f32 %v2037_v56, %v2668_v4 }
 0x1ae   : > { %v2039_v57 = vpop.eup %2038 }
 0x1af   : > { %v2041_v60 = vpop.eup %2040  ;;  %v827_v2 = vmul.f32 %v2039_v57, %v2673_v8  ;;  %2050 = vpow2.f32 %v1630_v61 }
 0x1b0   : > { %v782_v3 = vadd.f32 1.0, %v2041_v60  ;;  %v1996_v60 = vld [vmem:[#allocation8] sm:$0xff]  }
 0x1b1   : > { %v2043_v5 = vpop.eup %2042  ;;  %v839_v7 = vpack.c.bf16 %v827_v2, %v826_v1  ;;  %1800 = vmatprep.subr.bf16.mxu0 %v1996_v60  ;;  %1832 = vmatprep.subr.bf16.mxu1 %v1996_v60  ;;  %v1997_v1 = vld [vmem:[#allocation8 + $0x8] sm:$0xff]   ;;  %v1998_v2 = vld [vmem:[#allocation8 + $0x10] sm:$0xff]  }
 0x1b2   : > { %2052 = vrcp.f32 %v782_v3  ;;  %v783_v9 = vadd.f32 1.0, %v2043_v5  ;;  %v618_v11 = vpop.f32.mrb[28].mxu0  ;;  %1801 = vmatpush3.bf16.msra.mxu0 %v1996_v60  ;;  %1840 = vmatpush3.bf16.msra.mxu1 %v1996_v60  ;;  %v1999_v3 = vld [vmem:[#allocation8 + $0x18] sm:$0xff]   ;;  %v2000_v5 = vld [vmem:[#allocation8 + $0x20] sm:$0xff]  }
 0x1b3   : > { %v1631_v12 = vmul.f32 -1.442695, %v618_v11  ;;  %v2702_v13 = vpop.f32.mrb[29].mxu0  ;;  %1789 = vmatmul.mubr.bf16.gmra.mrb[20].mxu1 %v839_v7  ;;  %1802 = vmatprep.subr.bf16.mxu0 %v1997_v1  ;;  %v2001_v7 = vld [vmem:[#allocation8 + $0x28] sm:$0xff]  }
 0x1b4   : > { %v2045_v14 = vpop.eup %2044  ;;  %2054 = vrcp.f32 %v783_v9  ;;  %v622_v15 = vpop.f32.mrb[30].mxu0  ;;  %1833 = vmatprep.subr.bf16.mxu1 %v1997_v1  ;;  %v2002_v9 = vld [vmem:[#allocation8 + $0x30] sm:$0xff]  }
 0x1b5   : > { %2056 = vpow2.f32 %v1631_v12  ;;  %v1632_v16 = vmul.f32 -1.442695, %v622_v15  ;;  %v2704_v17 = vpop.f32.mrb[31].mxu0  ;;  %v828_v18 = vmul.f32 %v2045_v14, %v2678_v19 }
 0x1b6   : > { %v2047_v4 = vpop.eup %2046  ;;  %1803 = vmatpush3.bf16.msra.mxu0 %v1997_v1  ;;  %1841 = vmatpush3.bf16.msra.mxu1 %v1997_v1 }
 0x1b7   : > { %v2049_v8 = vpop.eup %2048  ;;  %v829_v20 = vmul.f32 %v2047_v4, %v2683_v23  ;;  %2058 = vpow2.f32 %v1632_v16  ;;  %1804 = vmatprep.subr.bf16.mxu0 %v1998_v2  ;;  %1834 = vmatprep.subr.bf16.mxu1 %v1998_v2 }
 0x1b8   : > { %v784_v22 = vadd.f32 1.0, %v2049_v8 }
 0x1b9   : > { %v2051_v24 = vpop.eup %2050  ;;  %v840_v26 = vpack.c.bf16 %v829_v20, %v828_v18 }
 0x1ba   : > { %2060 = vrcp.f32 %v784_v22  ;;  %v785_v27 = vadd.f32 1.0, %v2051_v24  ;;  %1805 = vmatpush3.bf16.msra.mxu0 %v1998_v2  ;;  %1842 = vmatpush3.bf16.msra.mxu1 %v1998_v2 }
 0x1bb   : > { %1792 = vmatprep.mubr.bf16.mxu1 %v840_v26  ;;  %1806 = vmatprep.subr.bf16.mxu0 %v1999_v3 }
 0x1bc   : > { %v2053_v28 = vpop.eup %2052  ;;  %2062 = vrcp.f32 %v785_v27  ;;  %1835 = vmatprep.subr.bf16.mxu1 %v1999_v3 }
 0x1bd   : > { %v830_v31 = vmul.f32 %v2053_v28, %v2688_v34  ;;  %v2709_v34 = vpop.f32.mrb[0].mxu1 }
 0x1be   : > { %v2055_v29 = vpop.eup %2054  ;;  %1807 = vmatpush3.bf16.msra.mxu0 %v1999_v3  ;;  %1843 = vmatpush3.bf16.msra.mxu1 %v1999_v3 }
 0x1bf   : > { %v2057_v30 = vpop.eup %2056  ;;  %v831_v32 = vmul.f32 %v2055_v29, %v602_v38  ;;  %v2711_v38 = vpop.f32.mrb[1].mxu1  ;;  %1808 = vmatprep.subr.bf16.mxu0 %v2000_v5  ;;  %1836 = vmatprep.subr.bf16.mxu1 %v2000_v5 }
 0x1c0   : > { %v786_v33 = vadd.f32 1.0, %v2057_v30  ;;  %v2713_v54 = vpop.f32.mrb[2].mxu1 }
 0x1c1   : > { %v2059_v35 = vpop.eup %2058  ;;  %v841_v37 = vpack.c.bf16 %v831_v32, %v830_v31  ;;  %v2715_v56 = vpop.f32.mrb[3].mxu1 }
 0x1c2   : > { %2064 = vrcp.f32 %v786_v33  ;;  %v787_v19 = vadd.f32 1.0, %v2059_v35  ;;  %v2717_v61 = vpop.f32.mrb[4].mxu1  ;;  %1809 = vmatpush3.bf16.msra.mxu0 %v2000_v5  ;;  %1844 = vmatpush3.bf16.msra.mxu1 %v2000_v5 }
 0x1c3   : > { %1793 = vmatmul.mubr.bf16.gmra.mrb[24].mxu1 %v841_v37  ;;  %1810 = vmatprep.subr.bf16.mxu0 %v2001_v7 }
 0x1c4   : > { %v2061_v23 = vpop.eup %2060  ;;  %2066 = vrcp.f32 %v787_v19  ;;  %1837 = vmatprep.subr.bf16.mxu1 %v2001_v7 }
 0x1c5   : > { %v832_v41 = vmul.f32 %v2061_v23, %v608_v53  ;;  %v2719_v53 = vpop.f32.mrb[5].mxu1 }
 0x1c6   : > { %v2063_v39 = vpop.eup %2062  ;;  %1811 = vmatpush3.bf16.msra.mxu0 %v2001_v7  ;;  %1845 = vmatpush3.bf16.msra.mxu1 %v2001_v7 }
 0x1c7   : > { %v833_v42 = vmul.f32 %v2063_v39, %v612_v58  ;;  %v2721_v58 = vpop.f32.mrb[6].mxu1  ;;  %1812 = vmatprep.subr.bf16.mxu0 %v2002_v9  ;;  %1838 = vmatprep.subr.bf16.mxu1 %v2002_v9 }
 0x1c8   : > { %v2723_v57 = vpop.f32.mrb[7].mxu1 }
 0x1c9   : > { %v842_v44 = vpack.c.bf16 %v833_v42, %v832_v41 }
 0x1ca   : > { %1813 = vmatpush3.bf16.msra.mxu0 %v2002_v9  ;;  %1846 = vmatpush3.bf16.msra.mxu1 %v2002_v9 }
 0x1cb   : > { %1796 = vmatprep.mubr.bf16.mxu1 %v842_v44 }
 0x1cc   : > { %v2065_v45 = vpop.eup %2064 }
 0x1cd   : > { %v834_v48 = vmul.f32 %v2065_v45, %v618_v11  ;;  %v2003_v11 = vld [vmem:[#allocation8 + $0x38] sm:$0xff]  }
 0x1ce   : > { %v2067_v47 = vpop.eup %2066  ;;  %1814 = vmatprep.subr.bf16.mxu0 %v2003_v11  ;;  %1839 = vmatprep.subr.bf16.mxu1 %v2003_v11 }
 0x1cf   : > { %v835_v50 = vmul.f32 %v2067_v47, %v622_v15  ;;  %1815 = vmatpush3.bf16.msra.mxu0 %v2003_v11  ;;  %1847 = vmatpush3.bf16.msra.mxu1 %v2003_v11 }
 0x1d1   : > { %v843_v51 = vpack.c.bf16 %v835_v50, %v834_v48 }
 0x1d3   : > { %1797 = vmatmul.mubr.bf16.gmra.mrb[28].mxu1 %v843_v51 }
 0x276   : > { %v1786_v12 = vpop.f32.mrb[16].mxu1 }
 0x277   : > { %v1007_v14 = vadd.f32 %v1786_v12, %v2657_v49  ;;  %v942_v15 = vpop.f32.mrb[17].mxu1 }
 0x278   : > { %v1005_v16 = vadd.f32 %v942_v15, %v2653_v43  ;;  %v1787_v4 = vpop.f32.mrb[18].mxu1 }
 0x279   : > { %v1643_v8 = vmul.f32 -1.442695, %v1007_v14  ;;  %v1008_v18 = vadd.f32 %v1787_v4, %v2659_v52  ;;  %v945_v20 = vpop.f32.mrb[19].mxu1 }
 0x27a   : > { %v1641_v22 = vmul.f32 -1.442695, %v1005_v16  ;;  %v1006_v24 = vadd.f32 %v945_v20, %v2655_v46 }
 0x27b   : > { %2068 = vpow2.f32 %v1643_v8  ;;  %v1644_v26 = vmul.f32 -1.442695, %v1008_v18 }
 0x27c   : > { %2070 = vpow2.f32 %v1641_v22  ;;  %v1642_v27 = vmul.f32 -1.442695, %v1006_v24 }
 0x27d   : > { %2072 = vpow2.f32 %v1644_v26 }
 0x27e   : > { %2074 = vpow2.f32 %v1642_v27 }
 0x285   : > { %v2069_v28 = vpop.eup %2068 }
 0x286   : > { %v2071_v29 = vpop.eup %2070  ;;  %v1071_v49 = vadd.f32 1.0, %v2069_v28  ;;  %v1790_v30 = vpop.f32.mrb[20].mxu1 }
 0x287   : > { %v2073_v31 = vpop.eup %2072  ;;  %v1069_v43 = vadd.f32 1.0, %v2071_v29  ;;  %v2730_v32 = vadd.f32 %v1790_v30, %v2671_v6  ;;  %v958_v52 = vpop.f32.mrb[21].mxu1 }
 0x288   : > { %v2075_v33 = vpop.eup %2074  ;;  %2076 = vrcp.f32 %v1071_v49  ;;  %v1072_v35 = vadd.f32 1.0, %v2073_v31  ;;  %v2733_v46 = vadd.f32 %v958_v52, %v2664_v59  ;;  %v1791_v37 = vpop.f32.mrb[22].mxu1 }
 0x289   : > { %2078 = vrcp.f32 %v1069_v43  ;;  %v1070_v19 = vadd.f32 1.0, %v2075_v33  ;;  %v1647_v23 = vmul.f32 -1.442695, %v2730_v32  ;;  %v1012_v39 = vadd.f32 %v1791_v37, %v2676_v10  ;;  %v961_v41 = vpop.f32.mrb[23].mxu1 }
 0x28a   : > { %2080 = vrcp.f32 %v1072_v35  ;;  %v1645_v42 = vmul.f32 -1.442695, %v2733_v46  ;;  %v1010_v6 = vadd.f32 %v961_v41, %v2666_v62 }
 0x28b   : > { %2082 = vrcp.f32 %v1070_v19  ;;  %v1648_v44 = vmul.f32 -1.442695, %v1012_v39 }
 0x28c   : > { %2084 = vpow2.f32 %v1647_v23  ;;  %v1646_v45 = vmul.f32 -1.442695, %v1010_v6 }
 0x28d   : > { %2086 = vpow2.f32 %v1645_v42 }
 0x28e   : > { %2088 = vpow2.f32 %v1648_v44 }
 0x28f   : > { %2090 = vpow2.f32 %v1646_v45 }
 0x292   : > { %v2077_v59 = vpop.eup %2076 }
 0x293   : > { %v2079_v47 = vpop.eup %2078  ;;  %v1119_v51 = vmul.f32 %v2077_v59, %v1007_v14 }
 0x294   : > { %v2081_v48 = vpop.eup %2080  ;;  %v1117_v1 = vmul.f32 %v2079_v47, %v1005_v16 }
 0x295   : > { %v2083_v50 = vpop.eup %2082  ;;  %v1120_v60 = vmul.f32 %v2081_v48, %v1008_v18 }
 0x296   : > { %v2085_v10 = vpop.eup %2084  ;;  %v1118_v2 = vmul.f32 %v2083_v50, %v1006_v24  ;;  %v1794_v3 = vpop.f32.mrb[24].mxu1 }
 0x297   : > { %v2087_v5 = vpop.eup %2086  ;;  %v1134_v7 = vpack.c.bf16 %v1120_v60, %v1119_v51  ;;  %v1075_v62 = vadd.f32 1.0, %v2085_v10  ;;  %v2740_v9 = vadd.f32 %v1794_v3, %v2691_v36  ;;  %v974_v11 = vpop.f32.mrb[25].mxu1 }
 0x298   : > { %v2089_v12 = vpop.eup %2088  ;;  %v1073_v15 = vadd.f32 1.0, %v2087_v5  ;;  %v2743_v4 = vadd.f32 %v974_v11, %v2681_v21  ;;  %v1795_v8 = vpop.f32.mrb[26].mxu1  ;;  %v1133_v20 = vpack.c.bf16 %v1118_v2, %v1117_v1 }
 0x299   : > { %v2091_v14 = vpop.eup %2090  ;;  %2092 = vrcp.f32 %v1075_v62  ;;  %v1076_v18 = vadd.f32 1.0, %v2089_v12  ;;  %v1651_v16 = vmul.f32 -1.442695, %v2740_v9  ;;  %v1016_v22 = vadd.f32 %v1795_v8, %v2693_v40  ;;  %v977_v24 = vpop.f32.mrb[27].mxu1 }
 0x29a   : > { %2094 = vrcp.f32 %v1073_v15  ;;  %v1074_v26 = vadd.f32 1.0, %v2091_v14  ;;  %v1649_v36 = vmul.f32 -1.442695, %v2743_v4  ;;  %v1014_v27 = vadd.f32 %v977_v24, %v2686_v25  ;;  %1816 = vmatprep.mubr.bf16.mxu0 %v1133_v20 }
 0x29b   : > { %2096 = vrcp.f32 %v1076_v18  ;;  %v1652_v21 = vmul.f32 -1.442695, %v1016_v22  ;;  %1817 = vmatmul.mubr.bf16.vlgmr.msra.gmra.mrb[32].mxu0 %v1134_v7 }
 0x29c   : > { %2098 = vrcp.f32 %v1074_v26  ;;  %v1650_v28 = vmul.f32 -1.442695, %v1014_v27 }
 0x29d   : > { %2100 = vpow2.f32 %v1651_v16 }
 0x29e   : > { %2102 = vpow2.f32 %v1649_v36 }
 0x29f   : > { %2104 = vpow2.f32 %v1652_v21 }
 0x2a0   : > { %2106 = vpow2.f32 %v1650_v28 }
 0x2a3   : > { %v2093_v29 = vpop.eup %2092 }
 0x2a4   : > { %v2095_v49 = vpop.eup %2094  ;;  %v1123_v31 = vmul.f32 %v2093_v29, %v2730_v32 }
 0x2a5   : > { %v2097_v40 = vpop.eup %2096  ;;  %v1121_v25 = vmul.f32 %v2095_v49, %v2733_v46 }
 0x2a6   : > { %v2099_v30 = vpop.eup %2098  ;;  %v1124_v43 = vmul.f32 %v2097_v40, %v1012_v39  ;;  %v1798_v52 = vpop.f32.mrb[28].mxu1 }
 0x2a7   : > { %v2101_v33 = vpop.eup %2100  ;;  %v1122_v35 = vmul.f32 %v2099_v30, %v1010_v6  ;;  %v1019_v37 = vadd.f32 %v1798_v52, %v2702_v13  ;;  %v990_v19 = vpop.f32.mrb[29].mxu1 }
 0x2a8   : > { %v2103_v23 = vpop.eup %2102  ;;  %v1079_v41 = vadd.f32 1.0, %v2101_v33  ;;  %v1017_v42 = vadd.f32 %v990_v19, %v2696_v55  ;;  %v1799_v44 = vpop.f32.mrb[30].mxu1  ;;  %v1136_v45 = vpack.c.bf16 %v1124_v43, %v1123_v31 }
 0x2a9   : > { %v2105_v59 = vpop.eup %2104  ;;  %v1077_v47 = vadd.f32 1.0, %v2103_v23  ;;  %v1020_v48 = vadd.f32 %v1799_v44, %v2704_v17  ;;  %v993_v32 = vpop.f32.mrb[31].mxu1  ;;  %v1135_v39 = vpack.c.bf16 %v1122_v35, %v1121_v25  ;;  %v1655_v46 = vmul.f32 -1.442695, %v1019_v37 }
 0x2aa   : > { %v2107_v50 = vpop.eup %2106  ;;  %2108 = vrcp.f32 %v1079_v41  ;;  %v1080_v51 = vadd.f32 1.0, %v2105_v59  ;;  %v1018_v6 = vadd.f32 %v993_v32, %v2698_v63  ;;  %v1653_v60 = vmul.f32 -1.442695, %v1017_v42 }
 0x2ab   : > { %2110 = vrcp.f32 %v1077_v47  ;;  %v1078_v13 = vadd.f32 1.0, %v2107_v50  ;;  %1820 = vmatprep.mubr.bf16.mxu0 %v1135_v39  ;;  %v1656_v55 = vmul.f32 -1.442695, %v1020_v48  ;;  %v1417_v44 = vlaneseq }
 0x2ac   : > { %2112 = vrcp.f32 %v1080_v51  ;;  %1821 = vmatmul.mubr.bf16.gmra.mrb[36].mxu0 %v1136_v45  ;;  %v1654_v10 = vmul.f32 -1.442695, %v1018_v6 }
 0x2ad   : > { %2114 = vrcp.f32 %v1078_v13 }
 0x2ae   : > { %2116 = vpow2.f32 %v1655_v46 }
 0x2af   : > { %2118 = vpow2.f32 %v1653_v60 }
 0x2b0   : > { %2120 = vpow2.f32 %v1656_v55 }
 0x2b1   : > { %2122 = vpow2.f32 %v1654_v10 }
 0x2b4   : > { %v2109_v17 = vpop.eup %2108 }
 0x2b5   : > { %v2111_v1 = vpop.eup %2110  ;;  %v1127_v5 = vmul.f32 %v2109_v17, %v2740_v9 }
 0x2b6   : > { %v2113_v2 = vpop.eup %2112  ;;  %v1125_v62 = vmul.f32 %v2111_v1, %v2743_v4 }
 0x2b7   : > { %v2115_v3 = vpop.eup %2114  ;;  %v1128_v63 = vmul.f32 %v2113_v2, %v1016_v22 }
 0x2b8   : > { %v2117_v7 = vpop.eup %2116  ;;  %v1126_v11 = vmul.f32 %v2115_v3, %v1014_v27 }
 0x2b9   : > { %v2119_v12 = vpop.eup %2118  ;;  %v1138_v15 = vpack.c.bf16 %v1128_v63, %v1127_v5  ;;  %v1083_v8 = vadd.f32 1.0, %v2117_v7 }
 0x2ba   : > { %v2121_v20 = vpop.eup %2120  ;;  %v1081_v14 = vadd.f32 1.0, %v2119_v12  ;;  %v1137_v18 = vpack.c.bf16 %v1126_v11, %v1125_v62 }
 0x2bb   : > { %v2123_v16 = vpop.eup %2122  ;;  %2124 = vrcp.f32 %v1083_v8  ;;  %v1084_v24 = vadd.f32 1.0, %v2121_v20 }
 0x2bc   : > { %2126 = vrcp.f32 %v1081_v14  ;;  %v1082_v26 = vadd.f32 1.0, %v2123_v16  ;;  %1824 = vmatprep.mubr.bf16.mxu1 %v1137_v18 }
 0x2bd   : > { %2128 = vrcp.f32 %v1084_v24  ;;  %1825 = vmatmul.mubr.bf16.vlgmr.msra.gmra.mrb[8].mxu1 %v1138_v15 }
 0x2be   : > { %2130 = vrcp.f32 %v1082_v26 }
 0x2c5   : > { %v2125_v9 = vpop.eup %2124 }
 0x2c6   : > { %v2127_v22 = vpop.eup %2126  ;;  %v1131_v27 = vmul.f32 %v2125_v9, %v1019_v37 }
 0x2c7   : > { %v2129_v36 = vpop.eup %2128  ;;  %v1129_v28 = vmul.f32 %v2127_v22, %v1017_v42 }
 0x2c8   : > { %v2131_v4 = vpop.eup %2130  ;;  %v1132_v21 = vmul.f32 %v2129_v36, %v1020_v48 }
 0x2c9   : > { %v1130_v29 = vmul.f32 %v2131_v4, %v1018_v6 }
 0x2ca   : > { %v1140_v49 = vpack.c.bf16 %v1132_v21, %v1131_v27 }
 0x2cb   : > { %v1139_v40 = vpack.c.bf16 %v1130_v29, %v1129_v28 }
 0x2cd   : > { %1828 = vmatprep.mubr.bf16.mxu1 %v1139_v40 }
 0x2ce   : > { %1829 = vmatmul.mubr.bf16.gmra.mrb[12].mxu1 %v1140_v49 }
 0x36e   : > { %v1818_v30 = vpop.f32.mrb[32].mxu0 }
 0x36f   : > { %v1304_v31 = vadd.f32 %v1818_v30, %v2709_v34  ;;  %v1239_v43 = vpop.f32.mrb[33].mxu0  ;;  %v1318_v34 = vld [vmem:[%s2881_s4] sm:$0x1] }
 0x370   : > { %v1302_v52 = vadd.f32 %v1239_v43, %v2711_v38  ;;  %v1819_v33 = vpop.f32.mrb[34].mxu0  ;;  %v1418_v38 = vshrl.u32 %v1417_v44, 7  ;;  %vm1319_vm0 = vcmp.gt.f32.partialorder %v1318_v34, 0.5 }
 0x371   : > { %v1667_v25 = vmul.f32 -1.442695, %v1304_v31  ;;  %v1305_v35 = vadd.f32 %v1819_v33, %v2713_v54  ;;  %v1242_v19 = vpop.f32.mrb[35].mxu0  ;;  %v1416_v6 = vsel %vm1319_vm0, 1, %v2394_v0 }
 0x372   : > { %v1665_v23 = vmul.f32 -1.442695, %v1302_v52  ;;  %v1303_v37 = vadd.f32 %v1242_v19, %v2715_v56  ;;  %v1419_v39 = vsub.s32 0, %v1418_v38 }
 0x373   : > { %2132 = vpow2.f32 %v1667_v25  ;;  %v1668_v41 = vmul.f32 -1.442695, %v1305_v35 }
 0x374   : > { %2134 = vpow2.f32 %v1665_v23  ;;  %v1666_v42 = vmul.f32 -1.442695, %v1303_v37  ;;  %v2772_v3 = vrot.slane %v1416_v6, %v1419_v39 }
 0x375   : > { %2136 = vpow2.f32 %v1668_v41 }
 0x376   : > { %2138 = vpow2.f32 %v1666_v42  ;;  %vm1421_vm1 = vcmp.eq.s32.totalorder %v2772_v3, 1 }
 0x37d   : > { %v2133_v45 = vpop.eup %2132 }
 0x37e   : > { %v2135_v59 = vpop.eup %2134  ;;  %v1370_v54 = vadd.f32 1.0, %v2133_v45 }
 0x37f   : > { %v2137_v47 = vpop.eup %2136  ;;  %v1368_v48 = vadd.f32 1.0, %v2135_v59  ;;  %v1822_v32 = vpop.f32.mrb[36].mxu0 }
 0x380   : > { %v2139_v56 = vpop.eup %2138  ;;  %2140 = vrcp.f32 %v1370_v54  ;;  %v1371_v50 = vadd.f32 1.0, %v2137_v47  ;;  %v2765_v51 = vadd.f32 %v1822_v32, %v2717_v61  ;;  %v1255_v46 = vpop.f32.mrb[37].mxu0 }
 0x381   : > { %2142 = vrcp.f32 %v1368_v48  ;;  %v1369_v13 = vadd.f32 1.0, %v2139_v56  ;;  %v1306_v60 = vadd.f32 %v1255_v46, %v2719_v53  ;;  %v1823_v55 = vpop.f32.mrb[38].mxu0 }
 0x382   : > { %2144 = vrcp.f32 %v1371_v50  ;;  %v1671_v10 = vmul.f32 -1.442695, %v2765_v51  ;;  %v1309_v17 = vadd.f32 %v1823_v55, %v2721_v58  ;;  %v1258_v1 = vpop.f32.mrb[39].mxu0 }
 0x383   : > { %2146 = vrcp.f32 %v1369_v13  ;;  %v1669_v2 = vmul.f32 -1.442695, %v1306_v60  ;;  %v1307_v61 = vadd.f32 %v1258_v1, %v2723_v57 }
 0x384   : > { %2148 = vpow2.f32 %v1671_v10  ;;  %v1672_v0 = vmul.f32 -1.442695, %v1309_v17 }
 0x385   : > { %2150 = vpow2.f32 %v1669_v2  ;;  %v1670_v5 = vmul.f32 -1.442695, %v1307_v61 }
 0x386   : > { %2152 = vpow2.f32 %v1672_v0 }
 0x387   : > { %2154 = vpow2.f32 %v1670_v5 }
 0x38a   : > { %v2141_v53 = vpop.eup %2140 }
 0x38b   : > { %v2143_v63 = vpop.eup %2142  ;;  %v1424_v58 = vsel %vm1421_vm1, %v2141_v53, %v1304_v31 }
 0x38c   : > { %v2145_v7 = vpop.eup %2144  ;;  %1440 = vst [vmem:[%s2778_s15 + $0x10] sm:$0xff] %v1424_v58  ;;  %v1422_v57 = vsel %vm1421_vm1, %v2143_v63, %v1302_v52 }
 0x38d   : > { %v2147_v62 = vpop.eup %2146  ;;  %1438 = vst [vmem:[%s2778_s15] sm:$0xff] %v1422_v57  ;;  %v1425_v11 = vsel %vm1421_vm1, %v2145_v7, %v1305_v35 }
 0x38e   : > { %v2149_v12 = vpop.eup %2148  ;;  %1441 = vst [vmem:[%s2778_s15 + $0x18] sm:$0xff] %v1425_v11  ;;  %v1423_v15 = vsel %vm1421_vm1, %v2147_v62, %v1303_v37 }
 0x38f   : > { %v2151_v8 = vpop.eup %2150  ;;  %1439 = vst [vmem:[%s2778_s15 + $0x8] sm:$0xff] %v1423_v15  ;;  %v1374_v20 = vadd.f32 1.0, %v2149_v12 }
 0x390   : > { %v2153_v14 = vpop.eup %2152  ;;  %v1372_v18 = vadd.f32 1.0, %v2151_v8  ;;  %v1826_v16 = vpop.f32.mrb[8].mxu1 }
 0x391   : > { %v2155_v24 = vpop.eup %2154  ;;  %2156 = vrcp.f32 %v1374_v20  ;;  %v1375_v26 = vadd.f32 1.0, %v2153_v14  ;;  %v1675_v9 = vmul.f32 -1.442695, %v1826_v16  ;;  %v1271_v22 = vpop.f32.mrb[9].mxu1 }
 0x392   : > { %2158 = vrcp.f32 %v1372_v18  ;;  %v1373_v36 = vadd.f32 1.0, %v2155_v24  ;;  %v1673_v4 = vmul.f32 -1.442695, %v1271_v22  ;;  %v1827_v27 = vpop.f32.mrb[10].mxu1 }
 0x393   : > { %2160 = vrcp.f32 %v1375_v26  ;;  %v1676_v21 = vmul.f32 -1.442695, %v1827_v27  ;;  %v1274_v28 = vpop.f32.mrb[11].mxu1 }
 0x394   : > { %2162 = vrcp.f32 %v1373_v36  ;;  %v1674_v29 = vmul.f32 -1.442695, %v1274_v28 }
 0x395   : > { %2164 = vpow2.f32 %v1675_v9 }
 0x396   : > { %2166 = vpow2.f32 %v1673_v4 }
 0x397   : > { %2168 = vpow2.f32 %v1676_v21 }
 0x398   : > { %2170 = vpow2.f32 %v1674_v29 }
 0x39b   : > { %v2157_v49 = vpop.eup %2156 }
 0x39c   : > { %v2159_v40 = vpop.eup %2158  ;;  %v1428_v30 = vsel %vm1421_vm1, %v2157_v49, %v2765_v51 }
 0x39d   : > { %v2161_v31 = vpop.eup %2160  ;;  %1444 = vst [vmem:[%s2778_s15 + $0x30] sm:$0xff] %v1428_v30  ;;  %v1426_v43 = vsel %vm1421_vm1, %v2159_v40, %v1306_v60 }
 0x39e   : > { %v2163_v52 = vpop.eup %2162  ;;  %1442 = vst [vmem:[%s2778_s15 + $0x20] sm:$0xff] %v1426_v43  ;;  %v1429_v33 = vsel %vm1421_vm1, %v2161_v31, %v1309_v17 }
 0x39f   : > { %v2165_v25 = vpop.eup %2164  ;;  %1445 = vst [vmem:[%s2778_s15 + $0x38] sm:$0xff] %v1429_v33  ;;  %v1427_v35 = vsel %vm1421_vm1, %v2163_v52, %v1307_v61 }
 0x3a0   : > { %v2167_v19 = vpop.eup %2166  ;;  %1443 = vst [vmem:[%s2778_s15 + $0x28] sm:$0xff] %v1427_v35  ;;  %v1378_v23 = vadd.f32 1.0, %v2165_v25 }
 0x3a1   : > { %v2169_v37 = vpop.eup %2168  ;;  %v1376_v41 = vadd.f32 1.0, %v2167_v19  ;;  %v1830_v42 = vpop.f32.mrb[12].mxu1 }
 0x3a2   : > { %v2171_v44 = vpop.eup %2170  ;;  %2172 = vrcp.f32 %v1378_v23  ;;  %v1379_v34 = vadd.f32 1.0, %v2169_v37  ;;  %v1679_v38 = vmul.f32 -1.442695, %v1830_v42  ;;  %v1287_v45 = vpop.f32.mrb[13].mxu1 }
 0x3a3   : > { %2174 = vrcp.f32 %v1376_v41  ;;  %v1377_v59 = vadd.f32 1.0, %v2171_v44  ;;  %v1677_v54 = vmul.f32 -1.442695, %v1287_v45  ;;  %v1831_v47 = vpop.f32.mrb[14].mxu1 }
 0x3a4   : > { %2176 = vrcp.f32 %v1379_v34  ;;  %v1680_v48 = vmul.f32 -1.442695, %v1831_v47  ;;  %v1290_v32 = vpop.f32.mrb[15].mxu1 }
 0x3a5   : > { %2178 = vrcp.f32 %v1377_v59  ;;  %v1678_v56 = vmul.f32 -1.442695, %v1290_v32 }
 0x3a6   : > { %2180 = vpow2.f32 %v1679_v38 }
 0x3a7   : > { %2182 = vpow2.f32 %v1677_v54 }
 0x3a8   : > { %2184 = vpow2.f32 %v1680_v48 }
 0x3a9   : > { %2186 = vpow2.f32 %v1678_v56 }
 0x3ac   : > { %v2173_v39 = vpop.eup %2172 }
 0x3ad   : > { %v2175_v50 = vpop.eup %2174  ;;  %v1432_v51 = vsel %vm1421_vm1, %v2173_v39, %v1826_v16 }
 0x3ae   : > { %v2177_v46 = vpop.eup %2176  ;;  %1448 = vst [vmem:[%s2778_s15 + $0x50] sm:$0xff] %v1432_v51  ;;  %v1430_v6 = vsel %vm1421_vm1, %v2175_v50, %v1271_v22 }
 0x3af   : > { %v2179_v13 = vpop.eup %2178  ;;  %1446 = vst [vmem:[%s2778_s15 + $0x40] sm:$0xff] %v1430_v6  ;;  %v1433_v60 = vsel %vm1421_vm1, %v2177_v46, %v1827_v27 }
 0x3b0   : > { %v2181_v55 = vpop.eup %2180  ;;  %1449 = vst [vmem:[%s2778_s15 + $0x58] sm:$0xff] %v1433_v60  ;;  %v1431_v10 = vsel %vm1421_vm1, %v2179_v13, %v1274_v28 }
 0x3b1   : > { %v2183_v17 = vpop.eup %2182  ;;  %1447 = vst [vmem:[%s2778_s15 + $0x48] sm:$0xff] %v1431_v10  ;;  %v1382_v1 = vadd.f32 1.0, %v2181_v55 }
 0x3b2   : > { %v2185_v2 = vpop.eup %2184  ;;  %v1380_v61 = vadd.f32 1.0, %v2183_v17 }
 0x3b3   : > { %v2187_v0 = vpop.eup %2186  ;;  %2188 = vrcp.f32 %v1382_v1  ;;  %v1383_v5 = vadd.f32 1.0, %v2185_v2 }
 0x3b4   : > { %2190 = vrcp.f32 %v1380_v61  ;;  %v1381_v53 = vadd.f32 1.0, %v2187_v0 }
 0x3b5   : > { %2192 = vrcp.f32 %v1383_v5 }
 0x3b6   : > { %2194 = vrcp.f32 %v1381_v53 }
 0x3bd   : > { %v2189_v63 = vpop.eup %2188 }
 0x3be   : > { %v2191_v58 = vpop.eup %2190  ;;  %v1436_v7 = vsel %vm1421_vm1, %v2189_v63, %v1830_v42 }
 0x3bf   : > { %v2193_v57 = vpop.eup %2192  ;;  %1452 = vst [vmem:[%s2778_s15 + $0x70] sm:$0xff] %v1436_v7  ;;  %v1434_v62 = vsel %vm1421_vm1, %v2191_v58, %v1287_v45 }
 0x3c0   : > { %v2195_v11 = vpop.eup %2194  ;;  %1450 = vst [vmem:[%s2778_s15 + $0x60] sm:$0xff] %v1434_v62  ;;  %v1437_v12 = vsel %vm1421_vm1, %v2193_v57, %v1831_v47 }
 0x3c1   : > { %1453 = vst [vmem:[%s2778_s15 + $0x78] sm:$0xff] %v1437_v12  ;;  %v1435_v15 = vsel %vm1421_vm1, %v2195_v11, %v1290_v32 }
 0x3c2   : > { %1451 = vst [vmem:[%s2778_s15 + $0x68] sm:$0xff] %v1435_v15 }
 0x3c3   : > { %2323 = shalt.err (!%p2320_p12)
}
 0x3c4   : > { %s2324_s11 = scalar_lea.hbm %s2825_s8, 2048  ;;  %s2328_s26 = scalar_lea.hbm %s2882_s5, 8192 }
 0x3c5   : > { %p2325_p0 = scmp.ne.s32.totalorder %s2825_s8, %s2324_s11  ;;  %p2329_p11 = scmp.lt.u32.totalorder %s2825_s8, %s2882_s5 }
 0x3c6   : > { %p2330_p1 = scmp.lt.u32.totalorder %s2328_s26, %s2324_s11  ;;  %p2332_p4 = scmp.lt.u32.totalorder %s2324_s11, %s2825_s8 }
 0x3c7   : > { %p2326_p5 = pnand %p2325_p0, %p2568_p8 }
 0x3c8   : > { %p2331_p2 = por %p2330_p1, %p2329_p11 }
 0x3c9   : > { %p2327_p10 = pneg %p2326_p5 }
 0x3ca   : > { %p2333_p6 = por %p2332_p4, %p2331_p2 }
 0x3cc   : > { %p2334_p13 = pnand %p2333_p6, %p2327_p10 }
 0x3ce   : > { %2337 = shalt.err (!%p2334_p13)
}
 0x3cf   : > { %s2396_s27 = smov 128   ;;  %s2397_s16 = smov 8  }
 0x3d0   : > { %1878 = dma.vmem_to_hbm [thread:$0]  (%p2568_p8), %s2827_s6, 2048, %s2825_s8, %s1455_s22, %s2396_s27, %s2396_s27, %s2397_s16  }
 0x3d1 PF: > { %p1905_p3 = scmp.ge.s32.totalorder %s2384_s21, 2  ;;  %s1483_s17 = sand.u32 1, %s2372_s18  }
 0x3d2   : > { %p2900_p7 = scmp.ne.s32.totalorder %s2887_s25, 0  ;;  %s1484_s28 = scalar_lea.sflag [#allocation4], %s1483_s17 }
 0x3d4   : > { %p1895_p9 = pnand %p1905_p3, %p2900_p7 }
 0x3d6   : > { %2367 = dma.done.wait (!%p1895_p9), %s1484_s28, 2048  }
 0x3d7   : > { %2369 = vsyncadd (!%p1895_p9), %s1484_s28, 4294965248  ;;  %p20_p12 = scmp.ge.s32.totalorder %s2533_s30, 6   ;;  %s2901_s18 = smov %s2376_s19 }
 0x3d8   : > { %s2902_s19 = smov %s2380_s20  ;;  %s2903_s20 = smov %s2564_s23 }
 0x3d9   : > { %s2904_s21 = smov %s2533_s30  ;;  %22 = sbr.rel (!%p20_p12) target bundleno = 7 (0x7), region = 97 }
 0x3e0   :  { %1489 = vsyncpa [#allocation3], 1 }
 0x3e1   :  { %1491 = vsyncpa [#allocation3 + $0x1], 1 }
 0x3e2   :  { %1492 = vsyncpa [#allocation6], 1 }
 0x3e3   :  { %1493 = vsyncpa [#allocation9], 1 }
 0x3e4   :  { %1494 = vsyncpa [#allocation4], 1 }
 0x3e5   :  { %1496 = vsyncpa [#allocation4 + $0x1], 1 }

</bundles_post_ra>
